<compile_context>
chip_gen: v5e
topology: v5e:2x2
jax: 0.10.0
libtpu: 0.0.40
codegen_flags: <defaults>
</compile_context>

<pallas_src>
import jax
import jax.numpy as jnp
from jax.experimental import pallas as pl
from jax.experimental.pallas import tpu as pltpu  # noqa: F401  (kept for TPU-specific extensions)


def _round_up(x, m):
    return ((x + m - 1) // m) * m


def _encode_pair(ids1, ids2, proj, bias, out1_ref, out2_ref):
    """Shared body: scaled one-hot gather+mean for both branches, one MXU dot.

    ids1, ids2 : (B, S) int32 token ids (values in [0, vocab))
    proj       : (Vp, H) f32   embedding table already projected by the fc weight
    bias       : (1, H) f32 or None
    out*_ref   : (B, H) f32 output refs
    """
    B, S = ids1.shape
    Vp = proj.shape[0]
    inv_s = jnp.float32(1.0 / S)

    # counts_scaled[b, v] = (#{s : ids[b, s] == v}) / S   -- 1/S folded into the one-hot.
    iota = jax.lax.broadcasted_iota(jnp.int32, (B, S, Vp), 2)          # lanes = vocab
    w1 = jnp.sum(jnp.where(iota == ids1[:, :, None], inv_s, jnp.float32(0.0)), axis=1)  # (B, Vp)
    w2 = jnp.sum(jnp.where(iota == ids2[:, :, None], inv_s, jnp.float32(0.0)), axis=1)  # (B, Vp)
    counts = jnp.concatenate([w1, w2], axis=0)                          # (2B, Vp)

    # mean_s(proj[ids]) for both branches in a single MXU pass.
    out = jnp.dot(counts, proj, preferred_element_type=jnp.float32)     # (2B, H)
    if bias is not None:
        out = out + bias                                                 # broadcast over rows

    out1_ref[...] = out[:B]
    out2_ref[...] = out[B:]


def _siamese_kernel(ids1_ref, ids2_ref, proj_ref, bias_ref, out1_ref, out2_ref):
    """Default path: fc weight already folded into proj_ref; add bias."""
    _encode_pair(ids1_ref[...], ids2_ref[...], proj_ref[...], bias_ref[...],
                 out1_ref, out2_ref)


def _siamese_param_kernel(ids1_ref, ids2_ref, ebd_ref, w_ref, out1_ref, out2_ref):
    """Param path (forward_once_with_param): project the padded table in-kernel, no bias."""
    # proj = E_pad @ W^T without an explicit transpose (contract the ebd_dim axis).
    proj = jax.lax.dot_general(
        ebd_ref[...], w_ref[...],
        dimension_numbers=(((1,), (1,)), ((), ())),
        preferred_element_type=jnp.float32)                              # (Vp, H)
    _encode_pair(ids1_ref[...], ids2_ref[...], proj, None, out1_ref, out2_ref)


def siamese_forward(ids_1, ids_2, proj_table, bias2d):
    """ids_* (B,S) int32, proj_table (Vp,H) f32, bias2d (1,H) f32 -> ((B,H), (B,H))."""
    B, _ = ids_1.shape
    _, H = proj_table.shape
    return pl.pallas_call(
        _siamese_kernel,
        out_shape=(jax.ShapeDtypeStruct((B, H), jnp.float32),
                   jax.ShapeDtypeStruct((B, H), jnp.float32)),
    )(ids_1, ids_2, proj_table, bias2d)


def siamese_forward_with_param(ids_1, ids_2, ebd_pad, weight):
    """ids_* (B,S) int32, ebd_pad (Vp,D) f32, weight (H,D) f32 -> ((B,H), (B,H))."""
    B, _ = ids_1.shape
    H = weight.shape[0]
    return pl.pallas_call(
        _siamese_param_kernel,
        out_shape=(jax.ShapeDtypeStruct((B, H), jnp.float32),
                   jax.ShapeDtypeStruct((B, H), jnp.float32)),
    )(ids_1, ids_2, ebd_pad, weight)


class ModelGPallas:
    """JAX/Pallas re-implementation of ModelG.forward."""

    def __init__(self, vocab_size=50, ebd_dim=300, out_dim=256, key=None):
        if key is None:
            key = jax.random.PRNGKey(0)
        k_ebd, k_w, k_b = jax.random.split(key, 3)
        # Shapes from the module: embedding (vocab, 300); fc = Linear(300, 256).
        self.vocab_size = vocab_size
        self.ebd_dim = ebd_dim
        self.out_dim = out_dim
        self.ebd_table = jax.random.normal(k_ebd, (vocab_size, ebd_dim),
                                           dtype=jnp.float32) * 0.1
        self.fc_weight = jax.random.normal(k_w, (out_dim, ebd_dim),
                                           dtype=jnp.float32) * 0.05      # (256, 300)
        self.fc_bias = jax.random.normal(k_b, (out_dim,),
                                         dtype=jnp.float32) * 0.01
        self.fc_bias2d = self.fc_bias.reshape(1, out_dim)                 # pre-shaped once

        # Pad vocab to a lane-friendly multiple of 128 once.
        self._vp = _round_up(vocab_size, 128)
        self.ebd_pad = jnp.zeros((self._vp, ebd_dim), dtype=jnp.float32
                                 ).at[:vocab_size].set(self.ebd_table)    # (Vp, 300)
        # Fold fc into the table once (default path): proj[v] = E[v] @ W^T.
        self.proj_table = jnp.dot(self.ebd_pad, self.fc_weight.T,
                                  preferred_element_type=jnp.float32)     # (Vp, 256)

    def __call__(self, inputs_1, inputs_2, param=None):
        # Ids are expected int32 in [0, vocab); cast only if needed (no extra op otherwise).
        if inputs_1.dtype != jnp.int32:
            inputs_1 = inputs_1.astype(jnp.int32)
        if inputs_2.dtype != jnp.int32:
            inputs_2 = inputs_2.astype(jnp.int32)
        if param is None:
            out_1, out_2 = siamese_forward(inputs_1, inputs_2,
                                           self.proj_table, self.fc_bias2d)
        else:
            w = jnp.asarray(param['weight'], dtype=jnp.float32)           # (256, 300)
            out_1, out_2 = siamese_forward_with_param(inputs_1, inputs_2,
                                                      self.ebd_pad, w)
        return out_1, out_2


if __name__ == "__main__":
    key = jax.random.PRNGKey(0)
    k_model, k_in1, k_in2, k_w2 = jax.random.split(key, 4)

    B, S, VOCAB = 2, 8, 50
    model = ModelGPallas(vocab_size=VOCAB, ebd_dim=300, out_dim=256, key=k_model)

    inputs_1 = jax.random.randint(k_in1, (B, S), 0, VOCAB, dtype=jnp.int32)
    inputs_2 = jax.random.randint(k_in2, (B, S), 0, VOCAB, dtype=jnp.int32)

    def ref_once(data, weight, bias):
        w2v = jnp.take(model.ebd_table, data, axis=0)          # (B, S, 300)
        avg = jnp.mean(w2v, axis=1)                            # (B, 300)
        out = avg @ weight.T
        return out + bias if bias is not None else out

    # ---- default (fc with bias) path --------------------------------------
    out_1, out_2 = model(inputs_1, inputs_2)
    out_1 = jax.block_until_ready(out_1)
    out_2 = jax.block_until_ready(out_2)

    r1 = ref_once(inputs_1, model.fc_weight, model.fc_bias)
    r2 = ref_once(inputs_2, model.fc_weight, model.fc_bias)
    assert out_1.shape == (B, 256) and out_2.shape == (B, 256)
    assert jnp.allclose(out_1, r1, atol=1e-4, rtol=1e-4)
    assert jnp.allclose(out_2, r2, atol=1e-4, rtol=1e-4)

    # ---- param path (F.linear, no bias), like forward_once_with_param ------
    param = {"weight": jax.random.normal(k_w2, (256, 300), dtype=jnp.float32) * 0.05}
    p1, p2 = model(inputs_1, inputs_2, param=param)
    p1 = jax.block_until_ready(p1)
    p2 = jax.block_until_ready(p2)
    pr1 = ref_once(inputs_1, param["weight"], None)
    pr2 = ref_once(inputs_2, param["weight"], None)
    assert jnp.allclose(p1, pr1, atol=1e-4, rtol=1e-4)
    assert jnp.allclose(p2, pr2, atol=1e-4, rtol=1e-4)

    print("KERNEL_OK")
</pallas_src>

<mosaic_0001>
module attributes {stable_mosaic.version = 11 : i64} {
  func.func @_siamese_kernel(%arg0: memref<2x8xi32, #tpu.memory_space<vmem>>, %arg1: memref<2x8xi32, #tpu.memory_space<vmem>>, %arg2: memref<128x256xf32, #tpu.memory_space<vmem>>, %arg3: memref<1x256xf32, #tpu.memory_space<vmem>>, %arg4: memref<2x256xf32, #tpu.memory_space<vmem>>, %arg5: memref<2x256xf32, #tpu.memory_space<vmem>>) attributes {dimension_semantics = [], scalar_prefetch = 0 : i64, scratch_operands = 0 : i64, tpu.core_type = #tpu.core_type<tc>} {
    %c0 = arith.constant 0 : index
    %c0_0 = arith.constant 0 : index
    %0 = vector.load %arg0[%c0, %c0_0] : memref<2x8xi32, #tpu.memory_space<vmem>>, vector<2x8xi32>
    %c0_1 = arith.constant 0 : index
    %c0_2 = arith.constant 0 : index
    %1 = vector.load %arg1[%c0_1, %c0_2] : memref<2x8xi32, #tpu.memory_space<vmem>>, vector<2x8xi32>
    %c0_3 = arith.constant 0 : index
    %c0_4 = arith.constant 0 : index
    %2 = vector.load %arg2[%c0_3, %c0_4] : memref<128x256xf32, #tpu.memory_space<vmem>>, vector<128x256xf32>
    %c0_5 = arith.constant 0 : index
    %c0_6 = arith.constant 0 : index
    %3 = vector.load %arg3[%c0_5, %c0_6] : memref<1x256xf32, #tpu.memory_space<vmem>>, vector<1x256xf32>
    %4 = tpu.iota {dimensions = array<i32: 2>} : vector<2x8x128xi32>
    %5 = vector.shape_cast %0 : vector<2x8xi32> to vector<2x8x1xi32>
    %6 = vector.broadcast %5 : vector<2x8x1xi32> to vector<2x8x128xi32>
    %7 = arith.cmpi eq, %4, %6 : vector<2x8x128xi32>
    %cst = arith.constant 1.250000e-01 : f32
    %cst_7 = arith.constant 0.000000e+00 : f32
    %8 = vector.broadcast %cst : f32 to vector<2x8x128xf32>
    %9 = vector.broadcast %cst_7 : f32 to vector<2x8x128xf32>
    %10 = arith.select %7, %8, %9 : vector<2x8x128xi1>, vector<2x8x128xf32>
    %cst_8 = arith.constant dense<0.000000e+00> : vector<2x128xf32>
    %11 = vector.multi_reduction <add>, %10, %cst_8 [1] : vector<2x8x128xf32> to vector<2x128xf32>
    %12 = vector.shape_cast %1 : vector<2x8xi32> to vector<2x8x1xi32>
    %13 = vector.broadcast %12 : vector<2x8x1xi32> to vector<2x8x128xi32>
    %14 = arith.cmpi eq, %4, %13 : vector<2x8x128xi32>
    %cst_9 = arith.constant 1.250000e-01 : f32
    %cst_10 = arith.constant 0.000000e+00 : f32
    %15 = vector.broadcast %cst_9 : f32 to vector<2x8x128xf32>
    %16 = vector.broadcast %cst_10 : f32 to vector<2x8x128xf32>
    %17 = arith.select %14, %15, %16 : vector<2x8x128xi1>, vector<2x8x128xf32>
    %cst_11 = arith.constant dense<0.000000e+00> : vector<2x128xf32>
    %18 = vector.multi_reduction <add>, %17, %cst_11 [1] : vector<2x8x128xf32> to vector<2x128xf32>
    %19 = tpu.concatenate %11, %18 in 0 : vector<2x128xf32>, vector<2x128xf32> -> vector<4x128xf32>
    %cst_12 = arith.constant dense<0.000000e+00> : vector<4x256xf32>
    %20 = tpu.matmul %19, %2, %cst_12 {dimension_numbers = #tpu.dot_dimension_numbers<[1], [0], [0], [1], [0, 0, 1, 1], [], []>} : vector<4x128xf32>, vector<128x256xf32>, vector<4x256xf32> -> vector<4x256xf32>
    %21 = vector.broadcast %3 : vector<1x256xf32> to vector<4x256xf32>
    %22 = arith.addf %20, %21 : vector<4x256xf32>
    %23 = vector.extract_strided_slice %22 {offsets = [0, 0], sizes = [2, 256], strides = [1, 1]} : vector<4x256xf32> to vector<2x256xf32>
    %c0_13 = arith.constant 0 : index
    %c0_14 = arith.constant 0 : index
    %24 = vector.load %arg4[%c0_13, %c0_14] : memref<2x256xf32, #tpu.memory_space<vmem>>, vector<2x256xf32>
    tpu.vector_store %arg4[%c0_13, %c0_14], %23 {strides = array<i32>} : memref<2x256xf32, #tpu.memory_space<vmem>>, vector<2x256xf32>,
    %25 = vector.extract_strided_slice %22 {offsets = [2, 0], sizes = [2, 256], strides = [1, 1]} : vector<4x256xf32> to vector<2x256xf32>
    %c0_15 = arith.constant 0 : index
    %c0_16 = arith.constant 0 : index
    %26 = vector.load %arg5[%c0_15, %c0_16] : memref<2x256xf32, #tpu.memory_space<vmem>>, vector<2x256xf32>
    tpu.vector_store %arg5[%c0_15, %c0_16], %25 {strides = array<i32>} : memref<2x256xf32, #tpu.memory_space<vmem>>, vector<2x256xf32>,
    return
  }
}

</mosaic_0001>

<bundles_post_ra>
// kernel: tpu_custom_call.1
= control target key start
LH: loop header
LB: loop body
LE: loop exit
PB: predicated region body
PF: predicated region fallthrough
CT: control target
= control target key end

     0   :  { %11 = vsyncpa [#allocation3], 0  ;;  %s462_s0 = inlined_call_operand.hbm [shape: s32[2,8], index: 0, kind: input, shape index: {}]   ;;  %s463_s1 = inlined_call_operand.hbm [shape: s32[2,8], index: 1, kind: input, shape index: {}]   ;;  %s464_s2 = inlined_call_operand.hbm [shape: f32[128,256], index: 2, kind: input, shape index: {}]   ;;  %s465_s3 = inlined_call_operand.vmem [shape: f32[1,256], index: 3, kind: input, shape index: {}]   ;;  %s466_s4 = inlined_call_operand.hbm [shape: f32[2,256], index: 4, kind: output, shape index: {0}]   ;;  %s467_s5 = inlined_call_operand.hbm [shape: f32[2,256], index: 5, kind: output, shape index: {1}]  }
   0x1   :  { %12 = vsyncpa [#allocation6], 0 }
   0x2   :  { %13 = vsyncpa [#allocation4], 0  ;;  %s31_s20 = sshll.u32 %s463_s1, 4  ;;  %s32_s20 = int_to_ptr.hbm [resolvable:$true] %s31_s20 }
   0x3   :  { %14 = vsyncpa [#allocation10], 0  ;;  %s402_s21 = smov [#allocation5]   ;;  %s20_s25 = sshll.u32 %s462_s0, 4  ;;  %s21_s25 = int_to_ptr.hbm [resolvable:$true] %s20_s25 }
   0x4   :  { %s33_s22 = sshll.u32 %s402_s21, 4  ;;  %s403_s26 = smov [#allocation2]   ;;  %s34_s22 = int_to_ptr.vmem [resolvable:$true] %s33_s22 }
   0x5   :  { %36 = dma.hbm_to_vmem [thread:$0]  %s32_s20, 32, %s34_s22, [#allocation6]  }
   0x6   :  { %s22_s27 = sshll.u32 %s403_s26, 4  ;;  %s41_s30 = sshll.u32 %s464_s2, 4  ;;  %s23_s27 = int_to_ptr.vmem [resolvable:$true] %s22_s27  ;;  %s42_s30 = int_to_ptr.hbm [resolvable:$true] %s41_s30 }
   0x7   :  { %25 = dma.hbm_to_vmem [thread:$0]  %s21_s25, 32, %s23_s27, [#allocation3]  }
   0x8   :  { %s404_s1 = smov [#allocation7]   ;;  %s405_s7 = smov 256  }
   0x9   :  { %s43_s6 = sshll.u32 %s404_s1, 4  ;;  %s406_s8 = smov 16   ;;  %s44_s6 = int_to_ptr.vmem [resolvable:$true] %s43_s6 }
   0xa   :  { %49 = dma.hbm_to_vmem [thread:$0]  %s42_s30, 4096, %s44_s6, [#allocation6], %s405_s7, %s405_s7, %s406_s8  }
   0xb   :  { %394 = dma.done.wait [#allocation3], 32  }
   0xc   :  { %395 = vsyncadd [#allocation3], 4294967264 }
   0xd   :  { %396 = dma.done.wait [#allocation6], 4128  }
   0xe   :  { %397 = vsyncadd [#allocation6], 4294963168  ;;  %v99_v0 = vlaneseq  ;;  %v65_v2 = vld [vmem:[#allocation5] sm:$0x3]  ;;  %v64_v3 = vld [vmem:[#allocation2] sm:$0x3] }
   0xf   :  { %v96_v4 = vld [vmem:[#allocation7 + $0xf0] sm:$0xff]  ;;  %v131_v5 = vperm.slane %v65_v2, 0  ;;  %v101_v6 = vperm.slane %v64_v3, 0  ;;  %v97_v7 = vld [vmem:[#allocation7 + $0xf8] sm:$0xff]  ;;  %v94_v8 = vld [vmem:[#allocation7 + $0xe0] sm:$0xff]  ;;  %v138_v14 = vperm.slane %v65_v2, 1 }
  0x10   :  { %v103_v1 = vshrl.u32 %v99_v0, 7  ;;  %178 = vmatpush.msra.mxu0 %v96_v4  ;;  %198 = vmatpush.msra.mxu1 %v97_v7  ;;  %v95_v9 = vld [vmem:[#allocation7 + $0xe8] sm:$0xff]  ;;  %v92_v10 = vld [vmem:[#allocation7 + $0xd0] sm:$0xff]  ;;  %v93_v11 = vld [vmem:[#allocation7 + $0xd8] sm:$0xff]  ;;  %v108_v15 = vperm.slane %v64_v3, 1  ;;  %v100_v40 = vand.u32 127, %v99_v0 }
  0x11   :  { %v90_v12 = vld [vmem:[#allocation7 + $0xc0] sm:$0xff]  ;;  %v91_v13 = vld [vmem:[#allocation7 + $0xc8] sm:$0xff]  ;;  %v88_v16 = vld [vmem:[#allocation7 + $0xb0] sm:$0xff]  ;;  %v407_v43 = vmov 0.0   ;;  %vm163_vm4 = vcmask 1041409   ;;  %vm168_vm5 = vcmask 1043459  }
  0x12   :  { %273 = vset.pattern.permute.xlu1 %v103_v1  ;;  %272 = vset.pattern.permute.xlu0 %v103_v1  ;;  %v89_v17 = vld [vmem:[#allocation7 + $0xb8] sm:$0xff]  ;;  %v86_v18 = vld [vmem:[#allocation7 + $0xa0] sm:$0xff]  ;;  %v87_v19 = vld [vmem:[#allocation7 + $0xa8] sm:$0xff]  ;;  %vm171_vm6 = vcmask 1041408   ;;  %s408_s9 = smov [#allocation8]   ;;  %s237_s13 = sshll.u32 %s466_s4, 4  ;;  %s238_s13 = int_to_ptr.hbm [resolvable:$true] %s237_s13 }
  0x13   :  { %179 = vmatpush.msra.mxu0 %v94_v8  ;;  %199 = vmatpush.msra.mxu1 %v95_v9  ;;  %v84_v20 = vld [vmem:[#allocation7 + $0x90] sm:$0xff]  ;;  %v85_v21 = vld [vmem:[#allocation7 + $0x98] sm:$0xff]  ;;  %v82_v22 = vld [vmem:[#allocation7 + $0x80] sm:$0xff]  ;;  %s235_s10 = sshll.u32 %s408_s9, 4  ;;  %s248_s17 = sshll.u32 %s467_s5, 4  ;;  %s236_s10 = int_to_ptr.vmem [resolvable:$true] %s235_s10  ;;  %s249_s17 = int_to_ptr.hbm [resolvable:$true] %s248_s17 }
  0x14   :  { %v83_v23 = vld [vmem:[#allocation7 + $0x88] sm:$0xff]  ;;  %v80_v24 = vld [vmem:[#allocation7 + $0x70] sm:$0xff]  ;;  %v81_v25 = vld [vmem:[#allocation7 + $0x78] sm:$0xff] }
  0x15   :  { %180 = vmatpush.msra.mxu0 %v92_v10  ;;  %200 = vmatpush.msra.mxu1 %v93_v11  ;;  %v78_v26 = vld [vmem:[#allocation7 + $0x60] sm:$0xff]  ;;  %v79_v27 = vld [vmem:[#allocation7 + $0x68] sm:$0xff]  ;;  %v76_v28 = vld [vmem:[#allocation7 + $0x50] sm:$0xff] }
  0x16   :  { %v77_v29 = vld [vmem:[#allocation7 + $0x58] sm:$0xff]  ;;  %v74_v30 = vld [vmem:[#allocation7 + $0x40] sm:$0xff]  ;;  %v75_v31 = vld [vmem:[#allocation7 + $0x48] sm:$0xff] }
  0x17   :  { %181 = vmatpush.msra.mxu0 %v90_v12  ;;  %201 = vmatpush.msra.mxu1 %v91_v13  ;;  %v72_v32 = vld [vmem:[#allocation7 + $0x30] sm:$0xff]  ;;  %v73_v33 = vld [vmem:[#allocation7 + $0x38] sm:$0xff]  ;;  %v70_v34 = vld [vmem:[#allocation7 + $0x20] sm:$0xff] }
  0x18   :  { %v71_v35 = vld [vmem:[#allocation7 + $0x28] sm:$0xff]  ;;  %v68_v36 = vld [vmem:[#allocation7 + $0x10] sm:$0xff]  ;;  %v69_v37 = vld [vmem:[#allocation7 + $0x18] sm:$0xff] }
  0x19   :  { %182 = vmatpush.msra.mxu0 %v88_v16  ;;  %202 = vmatpush.msra.mxu1 %v89_v17  ;;  %v66_v38 = vld [vmem:[#allocation7] sm:$0xff]  ;;  %v67_v39 = vld [vmem:[#allocation7 + $0x8] sm:$0xff]  ;;  %v98_v13 = vld [vmem:[%s465_s3] sm:$0x3]  ;;  %s409_s3 = smov [#allocation9]  }
  0x1a   :  { %136 = vperm.xlu1 %273, %v131_v5   ;;  %106 = vperm.xlu0 %272, %v101_v6   ;;  %s246_s14 = sshll.u32 %s409_s3, 4  ;;  %s247_s14 = int_to_ptr.vmem [resolvable:$true] %s246_s14 }
  0x1b   :  { %183 = vmatpush.msra.mxu0 %v86_v18  ;;  %203 = vmatpush.msra.mxu1 %v87_v19 }
  0x1d   :  { %184 = vmatpush.msra.mxu0 %v84_v20  ;;  %204 = vmatpush.msra.mxu1 %v85_v21 }
  0x1f   :  { %185 = vmatpush.msra.mxu0 %v82_v22  ;;  %205 = vmatpush.msra.mxu1 %v83_v23 }
  0x21   :  { %186 = vmatpush.msra.mxu0 %v80_v24  ;;  %206 = vmatpush.msra.mxu1 %v81_v25 }
  0x22   :  { %143 = vperm.xlu1 %273, %v138_v14   ;;  %113 = vperm.xlu0 %272, %v108_v15   ;;  %v174_v14 = vperm.slane %v98_v13, 0  ;;  %v175_v15 = vperm.slane %v98_v13, 1 }
  0x23   :  { %187 = vmatpush.msra.mxu0 %v78_v26  ;;  %207 = vmatpush.msra.mxu1 %v79_v27 }
  0x25   :  { %188 = vmatpush.msra.mxu0 %v76_v28  ;;  %208 = vmatpush.msra.mxu1 %v77_v29 }
  0x27   :  { %189 = vmatpush.msra.mxu0 %v74_v30  ;;  %209 = vmatpush.msra.mxu1 %v75_v31 }
  0x29   :  { %190 = vmatpush.msra.mxu0 %v72_v32  ;;  %210 = vmatpush.msra.mxu1 %v73_v33 }
  0x2b   :  { %191 = vmatpush.msra.mxu0 %v70_v34  ;;  %211 = vmatpush.msra.mxu1 %v71_v35 }
  0x2d   :  { %192 = vmatpush.msra.mxu0 %v68_v36  ;;  %212 = vmatpush.msra.mxu1 %v69_v37 }
  0x2f   :  { %193 = vmatpush.msra.mxu0 %v66_v38  ;;  %213 = vmatpush.msra.mxu1 %v67_v39 }
  0x8c   :  { %v137_v41 = vpop.permute.xlu1 %136  ;;  %v107_v42 = vpop.permute.xlu0 %106 }
  0x8d   :  { %vm145_vm0 = vcmp.eq.s32.totalorder %v100_v40, %v137_v41  ;;  %vm115_vm1 = vcmp.eq.s32.totalorder %v100_v40, %v107_v42 }
  0x8e   :  { %v147_v44 = vsel %vm145_vm0, 0.125, %v407_v43  ;;  %v117_v45 = vsel %vm115_vm1, 0.125, %v407_v43 }
  0x8f   :  { %v149_v46 = vrot.slane %v147_v44, 4  ;;  %v119_v47 = vrot.slane %v117_v45, 4 }
  0x91   :  { %v150_v48 = vadd.f32 %v149_v46, %v147_v44  ;;  %v120_v49 = vadd.f32 %v119_v47, %v117_v45 }
  0x93   :  { %v151_v52 = vrot.slane %v150_v48, 2  ;;  %v121_v53 = vrot.slane %v120_v49, 2 }
  0x94   :  { %v144_v50 = vpop.permute.xlu1 %143  ;;  %v114_v51 = vpop.permute.xlu0 %113 }
  0x95   :  { %vm146_vm2 = vcmp.eq.s32.totalorder %v100_v40, %v144_v50  ;;  %vm116_vm3 = vcmp.eq.s32.totalorder %v100_v40, %v114_v51  ;;  %v152_v58 = vadd.f32 %v151_v52, %v150_v48  ;;  %v122_v59 = vadd.f32 %v121_v53, %v120_v49 }
  0x96   :  { %v148_v54 = vsel %vm146_vm2, 0.125, %v407_v43  ;;  %v118_v55 = vsel %vm116_vm3, 0.125, %v407_v43 }
  0x97   :  { %v155_v56 = vrot.slane %v148_v54, 4  ;;  %v125_v57 = vrot.slane %v118_v55, 4  ;;  %v153_v0 = vrot.slane %v152_v58, 1  ;;  %v123_v1 = vrot.slane %v122_v59, 1 }
  0x99   :  { %v156_v60 = vadd.f32 %v155_v56, %v148_v54  ;;  %v126_v61 = vadd.f32 %v125_v57, %v118_v55  ;;  %v154_v6 = vadd.f32 %v153_v0, %v152_v58  ;;  %v124_v7 = vadd.f32 %v123_v1, %v122_v59 }
  0x9b   :  { %v157_v62 = vrot.slane %v156_v60, 2  ;;  %v127_v63 = vrot.slane %v126_v61, 2 }
  0x9d   :  { %v158_v2 = vadd.f32 %v157_v62, %v156_v60  ;;  %v128_v3 = vadd.f32 %v127_v63, %v126_v61 }
  0x9f   :  { %v159_v4 = vrot.slane %v158_v2, 1  ;;  %v129_v5 = vrot.slane %v128_v3, 1 }
  0xa1   :  { %v160_v8 = vadd.f32 %v159_v4, %v158_v2  ;;  %v130_v9 = vadd.f32 %v129_v5, %v128_v3 }
  0xa3   :  { %v164_v10 = vsel %vm163_vm4, %v130_v9, %v124_v7  ;;  %v169_v11 = vsel %vm168_vm5, %v160_v8, %v154_v6 }
  0xa4   :  { %v172_v12 = vsel %vm171_vm6, %v164_v10, %v169_v11 }
  0xa5   :  { %194 = vmatmul.f32.vlgmr.msra.gmra.mxu0 %v172_v12  ;;  %214 = vmatmul.f32.vlgmr.msra.gmra.mxu1 %v172_v12 }
 0x122   :  { %v195_v16 = vpop.f32.mrf.mxu0  ;;  %v215_v17 = vpop.f32.mrf.mxu1 }
 0x123   :  { %v196_v18 = vadd.f32 %v195_v16, %v174_v14  ;;  %v216_v19 = vadd.f32 %v215_v17, %v175_v15 }
 0x125   :  { %224 = vst.sshfl [vmem:[#allocation1] sm:$0xff pattern:$0x73625140] %v196_v18  ;;  %v220_v20 = vrot.slane %v216_v19, 6 }
 0x126   :  { %225 = vst.sshfl [vmem:[#allocation1 + $0x8] sm:$0xff pattern:$0x73625140] %v216_v19 }
 0x127   :  { %v221_v21 = vsel %vm171_vm6, %v196_v18, %v220_v20 }
 0x128   :  { %223 = vst [vmem:[#allocation8] sm:$0xf] %v221_v21 }
 0x129   :  { %240 = dma.vmem_to_hbm [thread:$0]  %s236_s10, 64, %s238_s13, [#allocation4]  }
 0x12d   :  { %v227_v22 = vld [vmem:[#allocation1 + $0x1] ss:$4 sm:$0xff] }
 0x12e   :  { %229 = vst [vmem:[#allocation9] sm:$0xf] %v227_v22 }
 0x12f   :  { %251 = dma.vmem_to_hbm [thread:$0]  %s247_s14, 64, %s249_s17, [#allocation10]  }
 0x130   :  { %398 = dma.done.wait [#allocation4], 64  }
 0x131   :  { %399 = vsyncadd [#allocation4], 4294967232 }
 0x132   :  { %400 = dma.done.wait [#allocation10], 64  }
 0x133   :  { %401 = vsyncadd [#allocation10], 4294967232 }
 0x134   :  { %260 = vsyncpa [#allocation3], 1 }
 0x135   :  { %261 = vsyncpa [#allocation6], 1 }
 0x136   :  { %262 = vsyncpa [#allocation4], 1 }
 0x137   :  { %263 = vsyncpa [#allocation10], 1 }

</bundles_post_ra>
